<compile_context>
chip_gen: v7x
topology: tpu7x:2x2x1
jax: 0.10.0
libtpu: 0.0.40
codegen_flags: <defaults>
</compile_context>

<pallas_src>
import math

import jax
import jax.numpy as jnp
from jax.experimental import pallas as pl
from jax.experimental.pallas import tpu as pltpu

HIDDEN = 100      # fixed by the module definition (Linear(emb_dim1, 100))
_LANE = 128
_SUBLANE = 8


def _round_up(x, m):
    return ((x + m - 1) // m) * m


def _mlp_kernel(x_ref, w1_ref, b1_ref, w2_ref, b2_ref, o_ref, h_ref):
    # Grid = (batch tiles i, out_dim tiles j); j is the inner (fast) axis.
    j = pl.program_id(1)

    # Layer 1 (x @ W1 + b1, ReLU) depends only on the batch tile: compute it
    # once per batch tile and cache it in VMEM scratch for all out_dim tiles.
    @pl.when(j == 0)
    def _():
        h = jnp.dot(x_ref[...], w1_ref[...], preferred_element_type=jnp.float32)
        h_ref[...] = jnp.maximum(h + b1_ref[...], 0.0)

    out = jnp.dot(h_ref[...], w2_ref[...], preferred_element_type=jnp.float32)
    o_ref[...] = (out + b2_ref[...]).astype(o_ref.dtype)


def metanet_forward(x, w1, b1, w2, b2, *, tb=None, tn=None):
    """x: (B, emb_dim1) -> (B, emb_dim1 * emb_dim2).

    w1: (emb_dim1, 100), b1: (100,), w2: (100, out_dim), b2: (out_dim,)
    (weights stored transposed relative to PyTorch so the kernel does x @ W).
    Handles ragged B / hidden=100 / arbitrary out_dim via zero-padding.
    """
    B, d1 = x.shape
    hidden = w1.shape[1]
    out_dim = w2.shape[1]

    hp = _round_up(hidden, _LANE)        # 100 -> 128: lane-aligned hidden
    out_p = _round_up(out_dim, _LANE)    # lane-dense output last dim

    # Batch tile: multiple of 8 sublanes, capped at 256 so large batches give
    # a many-step grid (pipelining + megacore sharding).
    if tb is None:
        tb = min(256, _round_up(B, _SUBLANE))
    tb = _round_up(tb, _SUBLANE)
    bp = _round_up(B, tb)

    # out_dim tile: largest of {1024, 512, 256, 128} dividing padded out_dim.
    # Bounds the double-buffered W2 / output tiles for v7x's 64 MiB VMEM while
    # keeping per-step overhead (~0.35 us) amortized.
    if tn is None:
        for cand in (1024, 512, 256, 128):
            if out_p % cand == 0:
                tn = cand
                break
    assert out_p % tn == 0 and bp % tb == 0

    # Zero-pad: padded hidden columns give h==0 after ReLU and meet zero W2
    # rows, padded out columns are sliced off -> bit-identical results.
    xp = jnp.pad(x, ((0, bp - B), (0, 0)))
    w1p = jnp.pad(w1, ((0, 0), (0, hp - hidden)))
    b1p = jnp.pad(b1.reshape(1, -1), ((0, 0), (0, hp - hidden)))
    w2p = jnp.pad(w2, ((0, hp - hidden), (0, out_p - out_dim)))
    b2p = jnp.pad(b2.reshape(1, -1), ((0, 0), (0, out_p - out_dim)))

    grid = (bp // tb, out_p // tn)
    itemsize = x.dtype.itemsize
    cost = pl.CostEstimate(
        flops=2 * bp * (d1 * hp + hp * out_p),
        transcendentals=0,
        bytes_accessed=(xp.size + w1p.size + b1p.size + w2p.size + b2p.size
                        + bp * out_p) * itemsize,
    )

    out = pl.pallas_call(
        _mlp_kernel,
        out_shape=jax.ShapeDtypeStruct((bp, out_p), x.dtype),
        grid_spec=pltpu.PrefetchScalarGridSpec(
            num_scalar_prefetch=0,
            grid=grid,
            in_specs=[
                pl.BlockSpec((tb, d1), lambda i, j: (i, 0)),      # x batch tile
                pl.BlockSpec((d1, hp), lambda i, j: (0, 0)),      # W1 (resident)
                pl.BlockSpec((1, hp), lambda i, j: (0, 0)),       # b1 (resident)
                pl.BlockSpec((hp, tn), lambda i, j: (0, j)),      # W2 out-tile
                pl.BlockSpec((1, tn), lambda i, j: (0, j)),       # b2 out-tile
            ],
            out_specs=pl.BlockSpec((tb, tn), lambda i, j: (i, j)),
            scratch_shapes=[pltpu.VMEM((tb, hp), jnp.float32)],   # cached h
        ),
        compiler_params=pltpu.CompilerParams(
            dimension_semantics=("parallel", "arbitrary"),
        ),
        cost_estimate=cost,
    )(xp, w1p, b1p, w2p, b2p)

    return out[:B, :out_dim]


def init_metanet_params(key, emb_dim1, emb_dim2, dtype=jnp.float32):
    """Params matching the module: xavier_normal_ weights, PyTorch-default
    uniform biases.  Weights returned as (in_features, out_features)."""
    out_dim = emb_dim1 * emb_dim2
    k1, k2, k3, k4 = jax.random.split(key, 4)

    def xavier_normal(k, fan_in, fan_out):
        std = math.sqrt(2.0 / (fan_in + fan_out))
        return (std * jax.random.normal(k, (fan_in, fan_out))).astype(dtype)

    def bias_uniform(k, fan_in, fan_out):
        bound = 1.0 / math.sqrt(fan_in)
        return jax.random.uniform(
            k, (fan_out,), minval=-bound, maxval=bound
        ).astype(dtype)

    w1 = xavier_normal(k1, emb_dim1, HIDDEN)
    b1 = bias_uniform(k2, emb_dim1, HIDDEN)
    w2 = xavier_normal(k3, HIDDEN, out_dim)
    b2 = bias_uniform(k4, HIDDEN, out_dim)
    return w1, b1, w2, b2


if __name__ == "__main__":
    emb_dim1, emb_dim2 = 32, 8     # out_dim = 256
    batch = 50                     # deliberately ragged (exercises padding)

    key = jax.random.PRNGKey(0)
    kx, kp = jax.random.split(key)

    x = jax.random.normal(kx, (batch, emb_dim1), dtype=jnp.float32)
    w1, b1, w2, b2 = init_metanet_params(kp, emb_dim1, emb_dim2)

    # tb=16 -> grid (4, 1): multi-step batch axis so the pipeline is exercised
    # even at this small demo size.
    out = metanet_forward(x, w1, b1, w2, b2, tb=16)
    out = jax.block_until_ready(out)

    # reference check in plain JAX against the UNPADDED parameters
    ref = jnp.maximum(x @ w1 + b1, 0.0) @ w2 + b2
    assert out.shape == (batch, emb_dim1 * emb_dim2)
    assert jnp.allclose(out, ref, atol=1e-5, rtol=1e-5), float(
        jnp.max(jnp.abs(out - ref))
    )

    print("KERNEL_OK")
</pallas_src>

<mosaic_0001>
module attributes {stable_mosaic.version = 11 : i64} {
  func.func @_mlp_kernel(%arg0: i32, %arg1: i32, %arg2: memref<16x32xf32, #tpu.memory_space<vmem>>, %arg3: memref<32x128xf32, #tpu.memory_space<vmem>>, %arg4: memref<1x128xf32, #tpu.memory_space<vmem>>, %arg5: memref<128x256xf32, #tpu.memory_space<vmem>>, %arg6: memref<1x256xf32, #tpu.memory_space<vmem>>, %arg7: memref<16x256xf32, #tpu.memory_space<vmem>>, %arg8: memref<16x128xf32, #tpu.memory_space<vmem>>) attributes {dimension_semantics = [#tpu.dimension_semantics<parallel>, #tpu.dimension_semantics<arbitrary>], iteration_bounds = array<i64: 4, 1>, scalar_prefetch = 0 : i64, scratch_operands = 1 : i64, tpu.core_type = #tpu.core_type<tc>, window_params = [{transform_indices = @transform_0, window_bounds = array<i64: 16, 32>}, {pipeline_mode = #tpu.pipeline_mode<synchronous>, transform_indices = @transform_1, window_bounds = array<i64: 32, 128>}, {pipeline_mode = #tpu.pipeline_mode<synchronous>, transform_indices = @transform_2, window_bounds = array<i64: 1, 128>}, {transform_indices = @transform_3, window_bounds = array<i64: 128, 256>}, {transform_indices = @transform_4, window_bounds = array<i64: 1, 256>}, {transform_indices = @transform_5, window_bounds = array<i64: 16, 256>}]} {
    %c0_i32 = arith.constant 0 : i32
    %0 = arith.cmpi eq, %arg1, %c0_i32 : i32
    %1 = arith.extui %0 : i1 to i32
    %c0_i32_0 = arith.constant 0 : i32
    %2 = arith.cmpi ne, %1, %c0_i32_0 : i32
    scf.if %2 {
      %c0_8 = arith.constant 0 : index
      %c0_9 = arith.constant 0 : index
      %10 = vector.load %arg2[%c0_8, %c0_9] : memref<16x32xf32, #tpu.memory_space<vmem>>, vector<16x32xf32>
      %c0_10 = arith.constant 0 : index
      %c0_11 = arith.constant 0 : index
      %11 = vector.load %arg3[%c0_10, %c0_11] : memref<32x128xf32, #tpu.memory_space<vmem>>, vector<32x128xf32>
      %cst_12 = arith.constant dense<0.000000e+00> : vector<16x128xf32>
      %12 = tpu.matmul %10, %11, %cst_12 {dimension_numbers = #tpu.dot_dimension_numbers<[1], [0], [0], [1], [0, 0, 1, 1], [], []>} : vector<16x32xf32>, vector<32x128xf32>, vector<16x128xf32> -> vector<16x128xf32>
      %c0_13 = arith.constant 0 : index
      %c0_14 = arith.constant 0 : index
      %13 = vector.load %arg4[%c0_13, %c0_14] : memref<1x128xf32, #tpu.memory_space<vmem>>, vector<1x128xf32>
      %14 = vector.broadcast %13 : vector<1x128xf32> to vector<16x128xf32>
      %15 = arith.addf %12, %14 : vector<16x128xf32>
      %cst_15 = arith.constant 0.000000e+00 : f32
      %16 = vector.broadcast %cst_15 : f32 to vector<16x128xf32>
      %17 = arith.maximumf %15, %16 : vector<16x128xf32>
      %c0_16 = arith.constant 0 : index
      %c0_17 = arith.constant 0 : index
      %18 = vector.load %arg8[%c0_16, %c0_17] : memref<16x128xf32, #tpu.memory_space<vmem>>, vector<16x128xf32>
      tpu.vector_store %arg8[%c0_16, %c0_17], %17 {strides = array<i32>} : memref<16x128xf32, #tpu.memory_space<vmem>>, vector<16x128xf32>,
    } else {
    }
    %c0 = arith.constant 0 : index
    %c0_1 = arith.constant 0 : index
    %3 = vector.load %arg8[%c0, %c0_1] : memref<16x128xf32, #tpu.memory_space<vmem>>, vector<16x128xf32>
    %c0_2 = arith.constant 0 : index
    %c0_3 = arith.constant 0 : index
    %4 = vector.load %arg5[%c0_2, %c0_3] : memref<128x256xf32, #tpu.memory_space<vmem>>, vector<128x256xf32>
    %cst = arith.constant dense<0.000000e+00> : vector<16x256xf32>
    %5 = tpu.matmul %3, %4, %cst {dimension_numbers = #tpu.dot_dimension_numbers<[1], [0], [0], [1], [0, 0, 1, 1], [], []>} : vector<16x128xf32>, vector<128x256xf32>, vector<16x256xf32> -> vector<16x256xf32>
    %c0_4 = arith.constant 0 : index
    %c0_5 = arith.constant 0 : index
    %6 = vector.load %arg6[%c0_4, %c0_5] : memref<1x256xf32, #tpu.memory_space<vmem>>, vector<1x256xf32>
    %7 = vector.broadcast %6 : vector<1x256xf32> to vector<16x256xf32>
    %8 = arith.addf %5, %7 : vector<16x256xf32>
    %c0_6 = arith.constant 0 : index
    %c0_7 = arith.constant 0 : index
    %9 = vector.load %arg7[%c0_6, %c0_7] : memref<16x256xf32, #tpu.memory_space<vmem>>, vector<16x256xf32>
    tpu.vector_store %arg7[%c0_6, %c0_7], %8 {strides = array<i32>} : memref<16x256xf32, #tpu.memory_space<vmem>>, vector<16x256xf32>,
    return
  }
  func.func @transform_0(%arg0: i32, %arg1: i32) -> (i32, i32) {
    %c0_i32 = arith.constant 0 : i32
    %c0_i32_0 = arith.constant 0 : i32
    return %arg0, %c0_i32 : i32, i32
  }
  func.func @transform_1(%arg0: i32, %arg1: i32) -> (i32, i32) {
    %c0_i32 = arith.constant 0 : i32
    %c0_i32_0 = arith.constant 0 : i32
    %c0_i32_1 = arith.constant 0 : i32
    return %c0_i32, %c0_i32_0 : i32, i32
  }
  func.func @transform_2(%arg0: i32, %arg1: i32) -> (i32, i32) {
    %c0_i32 = arith.constant 0 : i32
    %c0_i32_0 = arith.constant 0 : i32
    %c0_i32_1 = arith.constant 0 : i32
    return %c0_i32, %c0_i32_0 : i32, i32
  }
  func.func @transform_3(%arg0: i32, %arg1: i32) -> (i32, i32) {
    %c0_i32 = arith.constant 0 : i32
    %c0_i32_0 = arith.constant 0 : i32
    return %c0_i32, %arg1 : i32, i32
  }
  func.func @transform_4(%arg0: i32, %arg1: i32) -> (i32, i32) {
    %c0_i32 = arith.constant 0 : i32
    %c0_i32_0 = arith.constant 0 : i32
    return %c0_i32, %arg1 : i32, i32
  }
  func.func @transform_5(%arg0: i32, %arg1: i32) -> (i32, i32) {
    %c0_i32 = arith.constant 0 : i32
    return %arg0, %arg1 : i32, i32
  }
}

</mosaic_0001>

<bundles_post_ra>
// kernel: tpu_custom_call.1
= control target key start
LH: loop header
LB: loop body
LE: loop exit
PB: predicated region body
PF: predicated region fallthrough
CT: control target
= control target key end

     0   :  { %10 = vsyncpa [#allocation4], 0  ;;  %s1105_s0 = inlined_call_operand.vmem [shape: f32[64,32], index: 0, kind: input, shape index: {}]   ;;  %s1106_s1 = inlined_call_operand.vmem [shape: f32[32,128], index: 1, kind: input, shape index: {}]   ;;  %s1107_s2 = inlined_call_operand.vmem [shape: f32[1,128], index: 2, kind: input, shape index: {}]   ;;  %s1108_s3 = inlined_call_operand.hbm [shape: f32[128,256], index: 3, kind: input, shape index: {}]   ;;  %s1109_s4 = inlined_call_operand.vmem [shape: f32[1,256], index: 4, kind: input, shape index: {}]   ;;  %s1110_s5 = inlined_call_operand.hbm [shape: f32[64,256], index: 5, kind: output, shape index: {}]  }
   0x1   :  { %11 = vsyncpa [#allocation5], 0 }
   0x2   :  { %13 = vsyncpa [#allocation5 + $0x1], 0  ;;  %s929_s18 = smov 0   ;;  %s931_s19 = smov 0  }
   0x3   :  { %s933_s20 = smov 0   ;;  %s935_s21 = smov 0  }
   0x4   :  { %s937_s22 = smov 0   ;;  %s939_s23 = smov 0  }
   0x5 LB: > { %s630_s24 = sadd.s32 4294967295, %s890_s23   ;;  %s631_s25 = sadd.s32 4294967294, %s890_s23   ;;  %s890_s23 = sphi %s939_s23, %s19_s23   ;;  %s886_s22 = sphi %s937_s22, %s1128_s22   ;;  %s882_s21 = sphi %s935_s21, %s1127_s21   ;;  %s878_s20 = sphi %s933_s20, %s1126_s20   ;;  %s874_s19 = sphi %s931_s19, %s1125_s19   ;;  %s870_s18 = sphi %s929_s18, %s1124_s18  }
   0x6   : > { %s31_s26 = sadd.s32 1, %s886_s22  ;;  %s160_s27 = sadd.s32 1, %s878_s20 }
   0x7   : > { %p33_p0 = scmp.ge.s32.totalorder %s31_s26, 4  ;;  %p170_p1 = scmp.ne.s32.totalorder %s878_s20, %s874_s19 }
   0x8   : > { %p171_p2 = scmp.eq.s32.totalorder %s630_s24, 3  ;;  %p176_p3 = scmp.ne.s32.totalorder %s874_s19, %s870_s18 }
   0x9   : > { %s1130_s26 = smov (%p33_p0, %s31_s26), 0  ;;  %p177_p5 = scmp.eq.s32.totalorder %s631_s25, 3 }
   0xa   : > { %p969_p4 = por %p171_p2, %p170_p1  ;;  %s155_s29 = ssub.s32 %s886_s22, %s1130_s26 }
   0xb   : > { %p632_p6 = scmp.ge.s32.totalorder %s890_s23, 1  ;;  %p158_p7 = scmp.eq.s32.totalorder %s155_s29, 0 }
   0xc   : > { %s1115_s28 = scalar_select %p969_p4, 1, 0 }
   0xd   : > { %p976_p8 = por %p177_p5, %p176_p3  ;;  %p184_p9 = scmp.lt.s32.totalorder %s890_s23, 5 }
   0xe   : > { %s982_s6 = scalar_select %p158_p7, %s878_s20, %s160_s27  }
   0xf   : > { %s1116_s30 = scalar_select %p976_p8, 1, 0 }
  0x10   : > { %p984_p10 = pnand %p632_p6, %p184_p9  ;;  %p988_p11 = scmp.eq.s32.totalorder %s630_s24, 0 }
  0x11   : > { %s892_s9 = smov [#allocation3]   ;;  %s780_s14 = scalar_lea.hbm %s1108_s3, 4096 }
  0x12   : > { %s1117_s7 = scalar_select %p984_p10, 1, 0 }
  0x13   : > { %s1118_s8 = scalar_select %p988_p11, 1, 0 }
  0x14   : > { %p715_p12 = pneg %p984_p10  ;;  %s205_s10 = sshll.u32 %s892_s9, 4  ;;  %s206_s10 = int_to_ptr.vmem [resolvable:$true] %s205_s10 }
  0x15   : > { %p781_p0 = scmp.ne.s32.totalorder %s1108_s3, %s780_s14  ;;  %p787_p5 = scmp.lt.u32.totalorder %s780_s14, %s1108_s3 }
  0x16   : > { %p996_p13 = pnand %p988_p11, %p715_p12 }
  0x18   : > { %p782_p1 = pneg %p996_p13 }
  0x1a   : > { %p783_p2 = pnand %p782_p1, %p781_p0 }
  0x1c   : > { %p784_p3 = pneg %p783_p2 }
  0x1e   : > { %p789_p6 = pnand %p787_p5, %p784_p3 }
  0x20   : > { %792 = shalt.err (!%p789_p6)
}
  0x21   : > { %s793_s25 = scalar_lea.vmem %s206_s10, 4096  ;;  %p801_p8 = scmp.lt.s32.totalorder %s206_s10, %s206_s10 }
  0x22   : > { %p794_p7 = scmp.ne.s32.totalorder %s206_s10, %s793_s25  ;;  %p802_p4 = scmp.lt.s32.totalorder %s793_s25, %s793_s25 }
  0x24   : > { %p796_p9 = pnand %p794_p7, %p782_p1  ;;  %p803_p11 = por %p802_p4, %p801_p8 }
  0x26   : > { %p797_p12 = pneg %p796_p9 }
  0x28   : > { %p804_p10 = pnand %p803_p11, %p797_p12 }
  0x2a   : > { %807 = shalt.err (!%p804_p10)
}
  0x2b   : > { %s893_s27 = smov 256   ;;  %s894_s29 = smov 16  }
  0x2c   : > { %718 = dma.hbm_to_vmem [thread:$0]  (!%p996_p13), %s1108_s3, 4096, %s206_s10, [#allocation4], %s893_s27, %s893_s27, %s894_s29  }
  0x2d   : > { %p1120_p0 = scmp.ne.s32.totalorder %s1117_s7, 0 }
  0x2e   : > { %p1121_p2 = scmp.ne.s32.totalorder (!%p1120_p0), %s1118_s8, 0 }
  0x2f   : > { %238 = sbr.rel (%p1120_p0) target bundleno = 517 (0x205), region = 40 }
  0x36   : > { %861 = dma.done.wait (%p1121_p2), [#allocation4], 4096  }
  0x37   : > { %863 = vsyncadd (%p1121_p2), [#allocation4], 4294963200  ;;  %s639_s13 = sshll.u32 %s882_s21, 1  ;;  %vm301_vm0 = vcmask 261120   ;;  %v290_v0 = vld [vmem:[%s1106_s1] sm:$0xff]  ;;  %v291_v1 = vld [vmem:[%s1106_s1 + $0x8] sm:$0xff] }
  0x38   : > { %p271_p4 = scmp.lt.s32.totalorder %s639_s13, 7  ;;  %v292_v2 = vld [vmem:[%s1106_s1 + $0x10] sm:$0xff]  ;;  %v669_v3 = vpack.c.bf16 %v291_v1, %v290_v0  ;;  %v293_v4 = vld [vmem:[%s1106_s1 + $0x18] sm:$0xff]  ;;  %v390_v7 = vld [vmem:[#allocation3 + $0x8] sm:$0xff]  ;;  %v895_v56 = vmov 0.0   ;;  %v423_v0 = vlaneseq  ;;  %s651_s10 = sshll.u32 %s882_s21, 9 }
  0x39   : > { %v673_v6 = vpack.c.bf16 %v293_v4, %v292_v2  ;;  %v392_v8 = vld [vmem:[#allocation3 + $0x18] sm:$0xff]  ;;  %v389_v9 = vld [vmem:[#allocation3] sm:$0xff]  ;;  %v391_v11 = vld [vmem:[#allocation3 + $0x10] sm:$0xff]  ;;  %497 = vmatprep.mubr.f32.mxu1 %v895_v56  ;;  %s1057_s8 = scalar_lea.hbm %s1110_s5, %s651_s10  ;;  %p1122_p10 = scmp.ne.s32.totalorder %s1115_s28, 0 }
  0x3a   : > { %s1132_s13 = smov (!%p271_p4, %s639_s13), 7  ;;  %670 = vmatprep.subr.bf16.mxu0 %v669_v3  ;;  %v677_v10 = vpack.c.bf16 %v392_v8, %v390_v7  ;;  %v394_v12 = vld [vmem:[#allocation3 + $0x28] sm:$0xff]  ;;  %v396_v13 = vld [vmem:[#allocation3 + $0x38] sm:$0xff]  ;;  %v679_v14 = vpack.c.bf16 %v391_v11, %v389_v9  ;;  %v393_v16 = vld [vmem:[#allocation3 + $0x20] sm:$0xff]  ;;  %v424_v1 = vshrl.u32 %v423_v0, 7  ;;  %s896_s27 = smov [#allocation6]  }
  0x3b   : > { %s640_s14 = sshll.u32 %s1132_s13, 3  ;;  %672 = vmatpush3.bf16.msra.mxu0 %v669_v3  ;;  %v681_v15 = vpack.c.bf16 %v396_v13, %v394_v12  ;;  %v395_v17 = vld [vmem:[#allocation3 + $0x30] sm:$0xff]  ;;  %v398_v18 = vld [vmem:[#allocation3 + $0x48] sm:$0xff]  ;;  %v400_v19 = vld [vmem:[#allocation3 + $0x58] sm:$0xff]  ;;  %s267_s13 = sand.u32 1, %s874_s19  }
  0x3c   : > { %s1026_s16 = scalar_lea.vmem %s1105_s0, %s640_s14  ;;  %674 = vmatprep.subr.bf16.mxu0 %v673_v6  ;;  %678 = vmatprep.subr.bf16.mxu1 %v677_v10  ;;  %v683_v20 = vpack.c.bf16 %v395_v17, %v393_v16  ;;  %v685_v21 = vpack.c.bf16 %v400_v19, %v398_v18  ;;  %v397_v22 = vld [vmem:[#allocation3 + $0x40] sm:$0xff]  ;;  %v399_v23 = vld [vmem:[#allocation3 + $0x50] sm:$0xff]  ;;  %v402_v25 = vld [vmem:[#allocation3 + $0x68] sm:$0xff]  ;;  %v425_v2 = vsub.s32 0, %v424_v1  ;;  %v429_v4 = vsub.s32 1, %v424_v1  ;;  %s638_s11 = sshll.u32 %s267_s13, 5 }
  0x3d   : > { %v288_v5 = vld [vmem:[%s1026_s16] sm:$0xff]  ;;  %680 = vmatpush1.bf16.msra.mxu1 %v679_v14  ;;  %v289_v24 = vld [vmem:[%s1026_s16 + $0x8] sm:$0xff]  ;;  %v404_v26 = vld [vmem:[#allocation3 + $0x78] sm:$0xff]  ;;  %v687_v27 = vpack.c.bf16 %v399_v23, %v397_v22  ;;  %s269_s16 = scalar_lea.vmem [#allocation6], %s638_s11  ;;  %s1059_s25 = scalar_lea.sflag [#allocation5], %s267_s13 }
  0x3e   : > { %666 = vmatprep.mubr.msk.f32.mxu0 %vm301_vm0, %v288_v5  ;;  %682 = vmatprep.subr.bf16.mxu1 %v681_v15  ;;  %v689_v28 = vpack.c.bf16 %v404_v26, %v402_v25  ;;  %v401_v29 = vld [vmem:[#allocation3 + $0x60] sm:$0xff]  ;;  %v403_v30 = vld [vmem:[#allocation3 + $0x70] sm:$0xff]  ;;  %v406_v31 = vld [vmem:[#allocation3 + $0x88] sm:$0xff]  ;;  %s531_s7 = sshll.u32 %s269_s16, 4  ;;  %s812_s29 = sshll.u32 %s896_s27, 4  ;;  %s1052_s7 = int_to_ptr.vmem [resolvable:$true] %s531_s7  ;;  %s813_s29 = int_to_ptr.vmem [resolvable:$false] %s812_s29 }
  0x3f   : > { %676 = vmatpush3.bf16.msra.mxu0 %v673_v6  ;;  %v408_v32 = vld [vmem:[#allocation3 + $0x98] sm:$0xff]  ;;  %v691_v33 = vpack.c.bf16 %v403_v30, %v401_v29  ;;  %v405_v35 = vld [vmem:[#allocation3 + $0x80] sm:$0xff]  ;;  %v407_v36 = vld [vmem:[#allocation3 + $0x90] sm:$0xff]  ;;  %s808_s21 = scalar_lea.vmem %s1052_s7, 512  ;;  %s814_s9 = scalar_lea.vmem %s813_s29, 1024 }
  0x40   : > { %v693_v34 = vpack.c.bf16 %v408_v32, %v406_v31  ;;  %v410_v37 = vld [vmem:[#allocation3 + $0xa8] sm:$0xff]  ;;  %v412_v38 = vld [vmem:[#allocation3 + $0xb8] sm:$0xff]  ;;  %v695_v39 = vpack.c.bf16 %v407_v36, %v405_v35  ;;  %v409_v41 = vld [vmem:[#allocation3 + $0xa0] sm:$0xff]  ;;  %p809_p8 = scmp.ne.s32.totalorder %s1052_s7, %s808_s21  ;;  %p815_p1 = scmp.lt.s32.totalorder %s1052_s7, %s813_s29 }
  0x41   : > { %684 = vmatpush1.bf16.msra.mxu1 %v683_v20  ;;  %v697_v40 = vpack.c.bf16 %v412_v38, %v410_v37  ;;  %v411_v42 = vld [vmem:[#allocation3 + $0xb0] sm:$0xff]  ;;  %v414_v43 = vld [vmem:[#allocation3 + $0xc8] sm:$0xff]  ;;  %v416_v44 = vld [vmem:[#allocation3 + $0xd8] sm:$0xff]  ;;  %p816_p3 = scmp.lt.s32.totalorder %s814_s9, %s808_s21 }
  0x42   : > { %667 = vmatmul.mubr.msk.f32.vlgmr.msra.gmra.mrb[0].mxu0 %vm301_vm0, %v289_v24  ;;  %686 = vmatprep.subr.bf16.mxu1 %v685_v21  ;;  %v699_v45 = vpack.c.bf16 %v411_v42, %v409_v41  ;;  %v701_v46 = vpack.c.bf16 %v416_v44, %v414_v43  ;;  %v413_v47 = vld [vmem:[#allocation3 + $0xc0] sm:$0xff]  ;;  %v415_v48 = vld [vmem:[#allocation3 + $0xd0] sm:$0xff]  ;;  %v418_v50 = vld [vmem:[#allocation3 + $0xe8] sm:$0xff]  ;;  %p810_p11 = pnand %p809_p8, %p1122_p10 }
  0x43   : > { %v703_v49 = vpack.c.bf16 %v415_v48, %v413_v47  ;;  %v420_v51 = vld [vmem:[#allocation3 + $0xf8] sm:$0xff]  ;;  %v417_v53 = vld [vmem:[#allocation3 + $0xe0] sm:$0xff]  ;;  %v419_v54 = vld [vmem:[#allocation3 + $0xf0] sm:$0xff]  ;;  %p817_p5 = por %p816_p3, %p815_p1 }
  0x44   : > { %v705_v52 = vpack.c.bf16 %v420_v51, %v418_v50  ;;  %v707_v55 = vpack.c.bf16 %v419_v54, %v417_v53  ;;  %v641_v57 = vld [vmem:[%s1107_s2] ss:$0 sm:$0xff]  ;;  %p811_p13 = pneg %p810_p11 }
  0x45   : > { %688 = vmatpush1.bf16.msra.mxu1 %v687_v27  ;;  %v421_v3 = vld [vmem:[%s1109_s4] sm:$0x3] }
  0x46   : > { %690 = vmatprep.subr.bf16.mxu1 %v689_v28  ;;  %v426_v5 = vrot.slane %v421_v3, %v425_v2  ;;  %v430_v6 = vrot.slane %v421_v3, %v429_v4  ;;  %p818_p6 = pnand %p817_p5, %p811_p13 }
  0x49   : > { %692 = vmatpush1.bf16.msra.mxu1 %v691_v33 }
  0x4a   : > { %694 = vmatprep.subr.bf16.mxu1 %v693_v34 }
  0x4d   : > { %696 = vmatpush1.bf16.msra.mxu1 %v695_v39 }
  0x4e   : > { %698 = vmatprep.subr.bf16.mxu1 %v697_v40 }
  0x51   : > { %700 = vmatpush1.bf16.msra.mxu1 %v699_v45 }
  0x52   : > { %702 = vmatprep.subr.bf16.mxu1 %v701_v46 }
  0x55   : > { %704 = vmatpush1.bf16.msra.mxu1 %v703_v49 }
  0x56   : > { %706 = vmatprep.subr.bf16.mxu1 %v705_v52 }
  0x59   : > { %708 = vmatpush1.bf16.msra.mxu1 %v707_v55 }
 0x115   : > { %v668_v58 = vpop.f32.mrb[0].mxu0 }
 0x116   : > { %v374_v59 = vpop.f32.mrb[1].mxu0  ;;  %v380_v61 = vadd.f32 %v668_v58, %v641_v57 }
 0x117   : > { %v375_v60 = vadd.f32 %v641_v57, %v374_v59 }
 0x118   : > { %v384_v63 = vmax.f32 %v380_v61, 0.0 }
 0x119   : > { %v383_v62 = vmax.f32 %v375_v60, 0.0 }
 0x11b   : > { %498 = vmatmul.mubr.f32.vlgmr.msra.gmra.mrb[0].mxu1 %v383_v62 }
 0x11c   : > { %503 = vmatprep.mubr.f32.mxu1 %v895_v56 }
 0x11f   : > { %504 = vmatmul.mubr.f32.gmra.mrb[2].mxu1 %v384_v63 }
 0x1ee   : > { %v499_v7 = vpop.f32.mrb[0].mxu1 }
 0x1ef   : > { %v500_v8 = vadd.f32 %v499_v7, %v426_v5  ;;  %v501_v9 = vpop.f32.mrb[1].mxu1 }
 0x1f0   : > { %v502_v10 = vadd.f32 %v501_v9, %v430_v6 }
 0x1f1   : > { %510 = vst [vmem:[%s269_s16] sm:$0xff] %v500_v8 }
 0x1f2   : > { %511 = vst [vmem:[%s269_s16 + $0x8] sm:$0xff] %v502_v10  ;;  %v505_v11 = vpop.f32.mrb[2].mxu1 }
 0x1f3   : > { %v506_v12 = vadd.f32 %v505_v11, %v426_v5  ;;  %v507_v13 = vpop.f32.mrb[3].mxu1 }
 0x1f4   : > { %v508_v14 = vadd.f32 %v507_v13, %v430_v6 }
 0x1f5   : > { %512 = vst [vmem:[%s269_s16 + $0x10] sm:$0xff] %v506_v12 }
 0x1f6   : > { %513 = vst [vmem:[%s269_s16 + $0x18] sm:$0xff] %v508_v14 }
 0x1f7   : > { %821 = shalt.err (!%p818_p6)
}
 0x1f8   : > { %s822_s12 = scalar_lea.hbm %s1057_s8, 512  ;;  %s826_s15 = scalar_lea.hbm %s1110_s5, 2048 }
 0x1f9   : > { %p823_p7 = scmp.ne.s32.totalorder %s1057_s8, %s822_s12  ;;  %p827_p0 = scmp.lt.u32.totalorder %s1057_s8, %s1110_s5 }
 0x1fa   : > { %p828_p2 = scmp.lt.u32.totalorder %s826_s15, %s822_s12  ;;  %p830_p8 = scmp.lt.u32.totalorder %s822_s12, %s1057_s8 }
 0x1fb   : > { %p824_p9 = pnand %p823_p7, %p1122_p10 }
 0x1fc   : > { %p829_p4 = por %p828_p2, %p827_p0 }
 0x1fd   : > { %p825_p12 = pneg %p824_p9 }
 0x1fe   : > { %p831_p11 = por %p830_p8, %p829_p4 }
 0x200   : > { %p832_p13 = pnand %p831_p11, %p825_p12 }
 0x202   : > { %835 = shalt.err (!%p832_p13)
}
 0x203   : > { %s897_s10 = smov 256   ;;  %s898_s17 = smov 16  }
 0x204   : > { %713 = dma.vmem_to_hbm [thread:$0]  (%p1122_p10), %s1052_s7, 512, %s1057_s8, %s1059_s25, %s897_s10, %s897_s10, %s898_s17  }
 0x205 PF: > { %p725_p1 = scmp.ge.s32.totalorder %s890_s23, 2  ;;  %s546_s24 = sand.u32 1, %s870_s18  }
 0x206   : > { %p1123_p3 = scmp.ne.s32.totalorder %s1116_s30, 0  ;;  %s547_s21 = scalar_lea.sflag [#allocation5], %s546_s24 }
 0x208   : > { %p720_p5 = pnand %p725_p1, %p1123_p3 }
 0x20a   : > { %865 = dma.done.wait (!%p720_p5), %s547_s21, 512  }
 0x20b   : > { %867 = vsyncadd (!%p720_p5), %s547_s21, 4294966784  ;;  %s19_s23 = sadd.s32 1, %s890_s23   ;;  %s1124_s18 = smov %s874_s19 }
 0x20c   : > { %p16_p6 = scmp.ge.s32.totalorder %s19_s23, 6   ;;  %s1125_s19 = smov %s878_s20 }
 0x20d   : > { %s1126_s20 = smov %s982_s6  ;;  %s1127_s21 = smov %s886_s22 }
 0x20e   : > { %s1128_s22 = smov %s1130_s26  ;;  %18 = sbr.rel (!%p16_p6) target bundleno = 5 (0x5), region = 88 }
 0x215   :  { %552 = vsyncpa [#allocation4], 1 }
 0x216   :  { %554 = vsyncpa [#allocation4 + $0x1], 1 }
 0x217   :  { %555 = vsyncpa [#allocation5], 1 }
 0x218   :  { %557 = vsyncpa [#allocation5 + $0x1], 1 }

</bundles_post_ra>
